<compile_context>
chip_gen: v6e
topology: v6e:2x2x1
jax: 0.10.0
libtpu: 0.0.40
codegen_flags: <defaults>
</compile_context>

<pallas_src>
import functools

import jax
import jax.numpy as jnp
from jax import lax
from jax.experimental import pallas as pl
from jax.experimental.pallas import tpu as pltpu


def _shift_lanes(x, off):
    """out[:, p] = x[:, p + off] for 0 <= p + off < n, else 0.  `off` is static."""
    if off == 0:
        return x
    c, n = x.shape
    if off > 0:
        pad = jnp.zeros((c, off), x.dtype)
        return jnp.concatenate([x[:, off:], pad], axis=1)
    pad = jnp.zeros((c, -off), x.dtype)
    return jnp.concatenate([pad, x[:, :off]], axis=1)


def basic_stage_kernel(x_ref, wfold_ref, bias_ref, w2t_ref, o_ref, *, H, W, n_div):
    """Fused BasicStage: depth x (partial 3x3 -> 1x1 -> BN -> ReLU -> 1x1 -> +res)."""
    depth = wfold_ref.shape[0]
    _, C, HW = x_ref.shape
    Cc = C // n_div                                   # dim_conv3

    x = x_ref[0]                                      # (C, HW) f32 activation
    col_j = lax.broadcasted_iota(jnp.int32, (1, HW), 1) % W
    taps = [(ky - 1, kx - 1) for ky in range(3) for kx in range(3)]

    for d in range(depth):                            # unrolled at trace time
        xc = x[:Cc, :]                                # conv channels
        xu = x[Cc:, :]                                # untouched channels

        # In-kernel im2col of the 3x3 neighbourhood ('SAME' zero padding).
        # H-direction boundaries are handled by the zero fill of _shift_lanes;
        # W-direction row-wrap is masked with the column index.
        slabs = []
        for dy, dx in taps:
            s = _shift_lanes(xc, dy * W + dx)
            if dx == 1:                               # right edge invalid
                s = jnp.where(col_j < W - 1, s, 0.0)
            elif dx == -1:                            # left edge invalid
                s = jnp.where(col_j > 0, s, 0.0)
            slabs.append(s)
        slabs.append(xu)
        stack = jnp.concatenate(slabs, axis=0).astype(jnp.bfloat16)   # (9*Cc+Cu, HW)

        # (partial conv -> grouped 1x1 -> BN scale) folded into one matmul.
        h = jnp.dot(wfold_ref[d], stack,
                    preferred_element_type=jnp.float32)               # (Hd, HW) f32
        h = jnp.maximum(h + bias_ref[d], 0.0)                         # BN bias + ReLU
        # second grouped 1x1 conv
        y = jnp.dot(w2t_ref[d], h.astype(jnp.bfloat16),
                    preferred_element_type=jnp.float32)               # (C, HW) f32
        x = x + y                                                     # residual

    o_ref[0] = x


def basic_stage_pallas(x_nchw, stage_params, *, n_div):
    """BasicStage.forward.  Input/output are NCHW f32 (like PyTorch)."""
    N, C, H, W = x_nchw.shape
    HW = H * W
    wfold = stage_params["wfold"]      # (depth, Hd, 9*Cc + Cu) bf16, BN scale folded
    bias = stage_params["bias"]        # (depth, Hd, 1) f32
    w2t = stage_params["w2t"]          # (depth, C, Hd) bf16
    depth, Hd, Kf = wfold.shape

    kernel = functools.partial(basic_stage_kernel, H=H, W=W, n_div=n_div)
    out = pl.pallas_call(
        kernel,
        out_shape=jax.ShapeDtypeStruct((N, C, HW), jnp.float32),
        grid=(N,),
        in_specs=[
            pl.BlockSpec((1, C, HW), lambda n: (n, 0, 0)),
            pl.BlockSpec((depth, Hd, Kf), lambda n: (0, 0, 0)),
            pl.BlockSpec((depth, Hd, 1), lambda n: (0, 0, 0)),
            pl.BlockSpec((depth, C, Hd), lambda n: (0, 0, 0)),
        ],
        out_specs=pl.BlockSpec((1, C, HW), lambda n: (n, 0, 0)),
        compiler_params=pltpu.CompilerParams(
            dimension_semantics=("parallel",)),
    )(x_nchw.reshape(N, C, HW), wfold, bias, w2t)
    return out.reshape(N, C, H, W)


# ------------------------- parameter construction -------------------------

def make_block_params(key, dim, n_div, mlp_ratio, groups, eps=1e-5):
    Cc = dim // n_div
    Hd = int(dim * mlp_ratio)
    ks = jax.random.split(key, 7)
    # PyTorch-shaped weights (OIHW)
    w3_t = 0.1 * jax.random.normal(ks[0], (Cc, Cc, 3, 3), jnp.float32)
    w1_t = 0.1 * jax.random.normal(ks[1], (Hd, dim // groups, 1, 1), jnp.float32)
    w2_t = 0.1 * jax.random.normal(ks[2], (dim, Hd // groups, 1, 1), jnp.float32)
    gamma = 1.0 + 0.1 * jax.random.normal(ks[3], (Hd,), jnp.float32)
    beta = 0.1 * jax.random.normal(ks[4], (Hd,), jnp.float32)
    rmean = 0.1 * jax.random.normal(ks[5], (Hd,), jnp.float32)
    rvar = jnp.abs(jax.random.normal(ks[6], (Hd,), jnp.float32)) + 0.5

    # Block-diagonal dense embedding of the grouped 1x1 convs.
    Cg, Hg = dim // groups, Hd // groups
    w1_dense = jnp.zeros((dim, Hd), jnp.float32)
    w2_dense = jnp.zeros((Hd, dim), jnp.float32)
    for g in range(groups):
        w1_dense = w1_dense.at[g * Cg:(g + 1) * Cg, g * Hg:(g + 1) * Hg].set(
            w1_t[g * Hg:(g + 1) * Hg, :, 0, 0].T)
        w2_dense = w2_dense.at[g * Hg:(g + 1) * Hg, g * Cg:(g + 1) * Cg].set(
            w2_t[g * Cg:(g + 1) * Cg, :, 0, 0].T)
    scale = gamma / jnp.sqrt(rvar + eps)          # folded BatchNorm (eval)
    bias = beta - rmean * scale
    return {
        "w3_t": w3_t, "w1_t": w1_t, "w2_t": w2_t,
        "gamma": gamma, "beta": beta, "rmean": rmean, "rvar": rvar,
        "w1_dense": w1_dense, "w2_dense": w2_dense,
        "bn_scale": scale, "bn_bias": bias,
    }


def fold_stage_params(block_params, dim, n_div):
    """Fold 3x3 partial conv + BN scale into one (Hd, 9*Cc+Cu) matrix per block."""
    Cc = dim // n_div
    wfold_l, bias_l, w2t_l = [], [], []
    for p in block_params:
        w3_hwio = jnp.transpose(p["w3_t"], (2, 3, 1, 0))      # (3,3,Ci,Co)
        w1d, w2d = p["w1_dense"], p["w2_dense"]               # (C,Hd), (Hd,C)
        scale = p["bn_scale"].reshape(-1)                     # (Hd,)
        bias = p["bn_bias"].reshape(-1)                       # (Hd,)
        w1_c, w1_u = w1d[:Cc, :], w1d[Cc:, :]
        tap_blocks = [(w3_hwio[ky, kx] @ w1_c).T              # (Hd, Cc) per tap
                      for ky in range(3) for kx in range(3)]
        wfold = jnp.concatenate(tap_blocks + [w1_u.T], axis=1)  # (Hd, 9*Cc+Cu)
        wfold_l.append(scale[:, None] * wfold)                # fold BN scale
        bias_l.append(bias.reshape(-1, 1))
        w2t_l.append(w2d.T)
    return {
        "wfold": jnp.stack(wfold_l).astype(jnp.bfloat16),
        "bias": jnp.stack(bias_l).astype(jnp.float32),
        "w2t": jnp.stack(w2t_l).astype(jnp.bfloat16),
    }


# ------------------------- pure-JAX (NCHW) reference -------------------------

def basic_stage_ref(x_nchw, block_params, groups, eps=1e-5):
    dn = ("NCHW", "OIHW", "NCHW")
    x = x_nchw
    for p in block_params:
        shortcut = x
        Cc = p["w3_t"].shape[0]
        x1 = lax.conv_general_dilated(x[:, :Cc], p["w3_t"], (1, 1), "SAME",
                                      dimension_numbers=dn)
        xm = jnp.concatenate([x1, x[:, Cc:]], axis=1)
        h = lax.conv_general_dilated(xm, p["w1_t"], (1, 1), "SAME",
                                     dimension_numbers=dn,
                                     feature_group_count=groups)
        h = (h - p["rmean"][None, :, None, None]) / jnp.sqrt(
            p["rvar"][None, :, None, None] + eps)
        h = h * p["gamma"][None, :, None, None] + p["beta"][None, :, None, None]
        h = jnp.maximum(h, 0.0)
        y = lax.conv_general_dilated(h, p["w2_t"], (1, 1), "SAME",
                                     dimension_numbers=dn,
                                     feature_group_count=groups)
        x = shortcut + y
    return x


if __name__ == "__main__":
    # BasicStage(dim=32, depth=2, n_div=4, mlp_ratio=2, drop_path=[0,0],
    #            layer_scale_init_value=0, norm_layer=BatchNorm2d,
    #            act_layer=ReLU, pconv_fw_type='split_cat', groups=2)
    N, C, H, W = 2, 32, 16, 16
    depth, n_div, mlp_ratio, groups = 2, 4, 2, 2

    root = jax.random.PRNGKey(0)
    kx, *kb = jax.random.split(root, 1 + depth)
    x = jax.random.normal(kx, (N, C, H, W), jnp.float32)   # NCHW like PyTorch

    blocks = [make_block_params(kb[i], C, n_div, mlp_ratio, groups)
              for i in range(depth)]
    stage_params = fold_stage_params(blocks, C, n_div)

    out = basic_stage_pallas(x, stage_params, n_div=n_div)
    out = jax.block_until_ready(out)

    ref = basic_stage_ref(x, blocks, groups)
    assert out.shape == (N, C, H, W)
    assert jnp.allclose(out, ref, rtol=5e-2, atol=5e-2), (
        float(jnp.max(jnp.abs(out - ref))))

    print("KERNEL_OK")
</pallas_src>

<mosaic_0001>
module attributes {stable_mosaic.version = 11 : i64} {
  func.func @basic_stage_kernel(%arg0: i32, %arg1: memref<1x32x256xf32, #tpu.memory_space<vmem>>, %arg2: memref<2x64x96xbf16, #tpu.memory_space<vmem>>, %arg3: memref<2x64x1xf32, #tpu.memory_space<vmem>>, %arg4: memref<2x32x64xbf16, #tpu.memory_space<vmem>>, %arg5: memref<1x32x256xf32, #tpu.memory_space<vmem>>) attributes {dimension_semantics = [#tpu.dimension_semantics<parallel>], iteration_bounds = array<i64: 2>, scalar_prefetch = 0 : i64, scratch_operands = 0 : i64, tpu.core_type = #tpu.core_type<tc>, window_params = [{transform_indices = @transform_0, window_bounds = array<i64: 1, 32, 256>}, {pipeline_mode = #tpu.pipeline_mode<synchronous>, transform_indices = @transform_1, window_bounds = array<i64: 2, 64, 96>}, {pipeline_mode = #tpu.pipeline_mode<synchronous>, transform_indices = @transform_2, window_bounds = array<i64: 2, 64, 1>}, {pipeline_mode = #tpu.pipeline_mode<synchronous>, transform_indices = @transform_3, window_bounds = array<i64: 2, 32, 64>}, {transform_indices = @transform_4, window_bounds = array<i64: 1, 32, 256>}]} {
    %c0 = arith.constant 0 : index
    %c0_0 = arith.constant 0 : index
    %c0_1 = arith.constant 0 : index
    %0 = vector.load %arg1[%c0, %c0_0, %c0_1] : memref<1x32x256xf32, #tpu.memory_space<vmem>>, vector<1x32x256xf32>
    %1 = vector.shape_cast %0 : vector<1x32x256xf32> to vector<32x256xf32>
    %2 = tpu.iota {dimensions = array<i32: 1>} : vector<1x256xi32>
    %c16_i32 = arith.constant 16 : i32
    %c0_i32 = arith.constant 0 : i32
    %3 = arith.cmpi eq, %c16_i32, %c0_i32 : i32
    %c1_i32 = arith.constant 1 : i32
    %4 = arith.select %3, %c1_i32, %c16_i32 : i32
    %5 = vector.broadcast %4 : i32 to vector<1x256xi32>
    %6 = arith.remsi %2, %5 : vector<1x256xi32>
    %c0_i32_2 = arith.constant 0 : i32
    %7 = vector.broadcast %c0_i32_2 : i32 to vector<1x256xi32>
    %8 = arith.cmpi ne, %6, %7 : vector<1x256xi32>
    %c0_i32_3 = arith.constant 0 : i32
    %9 = vector.broadcast %c0_i32_3 : i32 to vector<1x256xi32>
    %10 = arith.cmpi slt, %6, %9 : vector<1x256xi32>
    %c0_i32_4 = arith.constant 0 : i32
    %11 = arith.cmpi slt, %4, %c0_i32_4 : i32
    %12 = vector.broadcast %11 : i1 to vector<1x256xi1>
    %13 = vector.broadcast %12 : vector<1x256xi1> to vector<1x256xi1>
    %14 = arith.xori %10, %13 : vector<1x256xi1>
    %15 = arith.andi %14, %8 : vector<1x256xi1>
    %16 = vector.broadcast %4 : i32 to vector<1x256xi32>
    %17 = arith.addi %6, %16 : vector<1x256xi32>
    %18 = arith.select %15, %17, %6 : vector<1x256xi1>, vector<1x256xi32>
    %19 = vector.extract_strided_slice %1 {offsets = [0, 0], sizes = [8, 256], strides = [1, 1]} : vector<32x256xf32> to vector<8x256xf32>
    %20 = vector.extract_strided_slice %1 {offsets = [8, 0], sizes = [24, 256], strides = [1, 1]} : vector<32x256xf32> to vector<24x256xf32>
    %cst = arith.constant 0.000000e+00 : f32
    %21 = vector.broadcast %cst : f32 to vector<8x17xf32>
    %22 = vector.extract_strided_slice %19 {offsets = [0, 0], sizes = [8, 239], strides = [1, 1]} : vector<8x256xf32> to vector<8x239xf32>
    %23 = tpu.concatenate %21, %22 in 1 : vector<8x17xf32>, vector<8x239xf32> -> vector<8x256xf32>
    %c0_i32_5 = arith.constant 0 : i32
    %24 = vector.broadcast %c0_i32_5 : i32 to vector<1x256xi32>
    %25 = arith.cmpi sgt, %18, %24 : vector<1x256xi32>
    %cst_6 = arith.constant 0.000000e+00 : f32
    %26 = vector.shape_cast %25 : vector<1x256xi1> to vector<1x256xi1>
    %27 = vector.broadcast %26 : vector<1x256xi1> to vector<8x256xi1>
    %28 = vector.broadcast %cst_6 : f32 to vector<8x256xf32>
    %29 = arith.select %27, %23, %28 : vector<8x256xi1>, vector<8x256xf32>
    %cst_7 = arith.constant 0.000000e+00 : f32
    %30 = vector.broadcast %cst_7 : f32 to vector<8x16xf32>
    %31 = vector.extract_strided_slice %19 {offsets = [0, 0], sizes = [8, 240], strides = [1, 1]} : vector<8x256xf32> to vector<8x240xf32>
    %32 = tpu.concatenate %30, %31 in 1 : vector<8x16xf32>, vector<8x240xf32> -> vector<8x256xf32>
    %cst_8 = arith.constant 0.000000e+00 : f32
    %33 = vector.broadcast %cst_8 : f32 to vector<8x15xf32>
    %34 = vector.extract_strided_slice %19 {offsets = [0, 0], sizes = [8, 241], strides = [1, 1]} : vector<8x256xf32> to vector<8x241xf32>
    %35 = tpu.concatenate %33, %34 in 1 : vector<8x15xf32>, vector<8x241xf32> -> vector<8x256xf32>
    %c15_i32 = arith.constant 15 : i32
    %36 = vector.broadcast %c15_i32 : i32 to vector<1x256xi32>
    %37 = arith.cmpi slt, %18, %36 : vector<1x256xi32>
    %cst_9 = arith.constant 0.000000e+00 : f32
    %38 = vector.shape_cast %37 : vector<1x256xi1> to vector<1x256xi1>
    %39 = vector.broadcast %38 : vector<1x256xi1> to vector<8x256xi1>
    %40 = vector.broadcast %cst_9 : f32 to vector<8x256xf32>
    %41 = arith.select %39, %35, %40 : vector<8x256xi1>, vector<8x256xf32>
    %cst_10 = arith.constant 0.000000e+00 : f32
    %42 = vector.broadcast %cst_10 : f32 to vector<8x1xf32>
    %43 = vector.extract_strided_slice %19 {offsets = [0, 0], sizes = [8, 255], strides = [1, 1]} : vector<8x256xf32> to vector<8x255xf32>
    %44 = tpu.concatenate %42, %43 in 1 : vector<8x1xf32>, vector<8x255xf32> -> vector<8x256xf32>
    %c0_i32_11 = arith.constant 0 : i32
    %45 = vector.broadcast %c0_i32_11 : i32 to vector<1x256xi32>
    %46 = arith.cmpi sgt, %18, %45 : vector<1x256xi32>
    %cst_12 = arith.constant 0.000000e+00 : f32
    %47 = vector.shape_cast %46 : vector<1x256xi1> to vector<1x256xi1>
    %48 = vector.broadcast %47 : vector<1x256xi1> to vector<8x256xi1>
    %49 = vector.broadcast %cst_12 : f32 to vector<8x256xf32>
    %50 = arith.select %48, %44, %49 : vector<8x256xi1>, vector<8x256xf32>
    %cst_13 = arith.constant 0.000000e+00 : f32
    %51 = vector.broadcast %cst_13 : f32 to vector<8x1xf32>
    %52 = vector.extract_strided_slice %19 {offsets = [0, 1], sizes = [8, 255], strides = [1, 1]} : vector<8x256xf32> to vector<8x255xf32>
    %53 = tpu.concatenate %52, %51 in 1 : vector<8x255xf32>, vector<8x1xf32> -> vector<8x256xf32>
    %c15_i32_14 = arith.constant 15 : i32
    %54 = vector.broadcast %c15_i32_14 : i32 to vector<1x256xi32>
    %55 = arith.cmpi slt, %18, %54 : vector<1x256xi32>
    %cst_15 = arith.constant 0.000000e+00 : f32
    %56 = vector.shape_cast %55 : vector<1x256xi1> to vector<1x256xi1>
    %57 = vector.broadcast %56 : vector<1x256xi1> to vector<8x256xi1>
    %58 = vector.broadcast %cst_15 : f32 to vector<8x256xf32>
    %59 = arith.select %57, %53, %58 : vector<8x256xi1>, vector<8x256xf32>
    %cst_16 = arith.constant 0.000000e+00 : f32
    %60 = vector.broadcast %cst_16 : f32 to vector<8x15xf32>
    %61 = vector.extract_strided_slice %19 {offsets = [0, 15], sizes = [8, 241], strides = [1, 1]} : vector<8x256xf32> to vector<8x241xf32>
    %62 = tpu.concatenate %61, %60 in 1 : vector<8x241xf32>, vector<8x15xf32> -> vector<8x256xf32>
    %c0_i32_17 = arith.constant 0 : i32
    %63 = vector.broadcast %c0_i32_17 : i32 to vector<1x256xi32>
    %64 = arith.cmpi sgt, %18, %63 : vector<1x256xi32>
    %cst_18 = arith.constant 0.000000e+00 : f32
    %65 = vector.shape_cast %64 : vector<1x256xi1> to vector<1x256xi1>
    %66 = vector.broadcast %65 : vector<1x256xi1> to vector<8x256xi1>
    %67 = vector.broadcast %cst_18 : f32 to vector<8x256xf32>
    %68 = arith.select %66, %62, %67 : vector<8x256xi1>, vector<8x256xf32>
    %cst_19 = arith.constant 0.000000e+00 : f32
    %69 = vector.broadcast %cst_19 : f32 to vector<8x16xf32>
    %70 = vector.extract_strided_slice %19 {offsets = [0, 16], sizes = [8, 240], strides = [1, 1]} : vector<8x256xf32> to vector<8x240xf32>
    %71 = tpu.concatenate %70, %69 in 1 : vector<8x240xf32>, vector<8x16xf32> -> vector<8x256xf32>
    %cst_20 = arith.constant 0.000000e+00 : f32
    %72 = vector.broadcast %cst_20 : f32 to vector<8x17xf32>
    %73 = vector.extract_strided_slice %19 {offsets = [0, 17], sizes = [8, 239], strides = [1, 1]} : vector<8x256xf32> to vector<8x239xf32>
    %74 = tpu.concatenate %73, %72 in 1 : vector<8x239xf32>, vector<8x17xf32> -> vector<8x256xf32>
    %c15_i32_21 = arith.constant 15 : i32
    %75 = vector.broadcast %c15_i32_21 : i32 to vector<1x256xi32>
    %76 = arith.cmpi slt, %18, %75 : vector<1x256xi32>
    %cst_22 = arith.constant 0.000000e+00 : f32
    %77 = vector.shape_cast %76 : vector<1x256xi1> to vector<1x256xi1>
    %78 = vector.broadcast %77 : vector<1x256xi1> to vector<8x256xi1>
    %79 = vector.broadcast %cst_22 : f32 to vector<8x256xf32>
    %80 = arith.select %78, %74, %79 : vector<8x256xi1>, vector<8x256xf32>
    %81 = tpu.concatenate %29, %32, %41, %50, %19, %59, %68, %71, %80, %20 in 0 : vector<8x256xf32>, vector<8x256xf32>, vector<8x256xf32>, vector<8x256xf32>, vector<8x256xf32>, vector<8x256xf32>, vector<8x256xf32>, vector<8x256xf32>, vector<8x256xf32>, vector<24x256xf32> -> vector<96x256xf32>
    %82 = arith.truncf %81 : vector<96x256xf32> to vector<96x256xbf16>
    %c0_23 = arith.constant 0 : index
    %c0_24 = arith.constant 0 : index
    %c0_25 = arith.constant 0 : index
    %83 = vector.load %arg2[%c0_23, %c0_24, %c0_25] : memref<2x64x96xbf16, #tpu.memory_space<vmem>>, vector<1x64x96xbf16>
    %84 = vector.shape_cast %83 : vector<1x64x96xbf16> to vector<64x96xbf16>
    %cst_26 = arith.constant dense<0.000000e+00> : vector<64x256xf32>
    %85 = tpu.matmul %84, %82, %cst_26 {dimension_numbers = #tpu.dot_dimension_numbers<[1], [0], [0], [1], [0, 0, 1, 1], [], []>} : vector<64x96xbf16>, vector<96x256xbf16>, vector<64x256xf32> -> vector<64x256xf32>
    %c0_27 = arith.constant 0 : index
    %c0_28 = arith.constant 0 : index
    %c0_29 = arith.constant 0 : index
    %86 = vector.load %arg3[%c0_27, %c0_28, %c0_29] : memref<2x64x1xf32, #tpu.memory_space<vmem>>, vector<1x64x1xf32>
    %87 = vector.shape_cast %86 : vector<1x64x1xf32> to vector<64x1xf32>
    %88 = vector.broadcast %87 : vector<64x1xf32> to vector<64x256xf32>
    %89 = arith.addf %85, %88 : vector<64x256xf32>
    %cst_30 = arith.constant 0.000000e+00 : f32
    %90 = vector.broadcast %cst_30 : f32 to vector<64x256xf32>
    %91 = arith.maximumf %89, %90 : vector<64x256xf32>
    %c0_31 = arith.constant 0 : index
    %c0_32 = arith.constant 0 : index
    %c0_33 = arith.constant 0 : index
    %92 = vector.load %arg4[%c0_31, %c0_32, %c0_33] : memref<2x32x64xbf16, #tpu.memory_space<vmem>>, vector<1x32x64xbf16>
    %93 = vector.shape_cast %92 : vector<1x32x64xbf16> to vector<32x64xbf16>
    %94 = arith.truncf %91 : vector<64x256xf32> to vector<64x256xbf16>
    %cst_34 = arith.constant dense<0.000000e+00> : vector<32x256xf32>
    %95 = tpu.matmul %93, %94, %cst_34 {dimension_numbers = #tpu.dot_dimension_numbers<[1], [0], [0], [1], [0, 0, 1, 1], [], []>} : vector<32x64xbf16>, vector<64x256xbf16>, vector<32x256xf32> -> vector<32x256xf32>
    %96 = arith.addf %1, %95 : vector<32x256xf32>
    %97 = vector.extract_strided_slice %96 {offsets = [0, 0], sizes = [8, 256], strides = [1, 1]} : vector<32x256xf32> to vector<8x256xf32>
    %98 = vector.extract_strided_slice %96 {offsets = [8, 0], sizes = [24, 256], strides = [1, 1]} : vector<32x256xf32> to vector<24x256xf32>
    %cst_35 = arith.constant 0.000000e+00 : f32
    %99 = vector.broadcast %cst_35 : f32 to vector<8x17xf32>
    %100 = vector.extract_strided_slice %97 {offsets = [0, 0], sizes = [8, 239], strides = [1, 1]} : vector<8x256xf32> to vector<8x239xf32>
    %101 = tpu.concatenate %99, %100 in 1 : vector<8x17xf32>, vector<8x239xf32> -> vector<8x256xf32>
    %c0_i32_36 = arith.constant 0 : i32
    %102 = vector.broadcast %c0_i32_36 : i32 to vector<1x256xi32>
    %103 = arith.cmpi sgt, %18, %102 : vector<1x256xi32>
    %cst_37 = arith.constant 0.000000e+00 : f32
    %104 = vector.shape_cast %103 : vector<1x256xi1> to vector<1x256xi1>
    %105 = vector.broadcast %104 : vector<1x256xi1> to vector<8x256xi1>
    %106 = vector.broadcast %cst_37 : f32 to vector<8x256xf32>
    %107 = arith.select %105, %101, %106 : vector<8x256xi1>, vector<8x256xf32>
    %cst_38 = arith.constant 0.000000e+00 : f32
    %108 = vector.broadcast %cst_38 : f32 to vector<8x16xf32>
    %109 = vector.extract_strided_slice %97 {offsets = [0, 0], sizes = [8, 240], strides = [1, 1]} : vector<8x256xf32> to vector<8x240xf32>
    %110 = tpu.concatenate %108, %109 in 1 : vector<8x16xf32>, vector<8x240xf32> -> vector<8x256xf32>
    %cst_39 = arith.constant 0.000000e+00 : f32
    %111 = vector.broadcast %cst_39 : f32 to vector<8x15xf32>
    %112 = vector.extract_strided_slice %97 {offsets = [0, 0], sizes = [8, 241], strides = [1, 1]} : vector<8x256xf32> to vector<8x241xf32>
    %113 = tpu.concatenate %111, %112 in 1 : vector<8x15xf32>, vector<8x241xf32> -> vector<8x256xf32>
    %c15_i32_40 = arith.constant 15 : i32
    %114 = vector.broadcast %c15_i32_40 : i32 to vector<1x256xi32>
    %115 = arith.cmpi slt, %18, %114 : vector<1x256xi32>
    %cst_41 = arith.constant 0.000000e+00 : f32
    %116 = vector.shape_cast %115 : vector<1x256xi1> to vector<1x256xi1>
    %117 = vector.broadcast %116 : vector<1x256xi1> to vector<8x256xi1>
    %118 = vector.broadcast %cst_41 : f32 to vector<8x256xf32>
    %119 = arith.select %117, %113, %118 : vector<8x256xi1>, vector<8x256xf32>
    %cst_42 = arith.constant 0.000000e+00 : f32
    %120 = vector.broadcast %cst_42 : f32 to vector<8x1xf32>
    %121 = vector.extract_strided_slice %97 {offsets = [0, 0], sizes = [8, 255], strides = [1, 1]} : vector<8x256xf32> to vector<8x255xf32>
    %122 = tpu.concatenate %120, %121 in 1 : vector<8x1xf32>, vector<8x255xf32> -> vector<8x256xf32>
    %c0_i32_43 = arith.constant 0 : i32
    %123 = vector.broadcast %c0_i32_43 : i32 to vector<1x256xi32>
    %124 = arith.cmpi sgt, %18, %123 : vector<1x256xi32>
    %cst_44 = arith.constant 0.000000e+00 : f32
    %125 = vector.shape_cast %124 : vector<1x256xi1> to vector<1x256xi1>
    %126 = vector.broadcast %125 : vector<1x256xi1> to vector<8x256xi1>
    %127 = vector.broadcast %cst_44 : f32 to vector<8x256xf32>
    %128 = arith.select %126, %122, %127 : vector<8x256xi1>, vector<8x256xf32>
    %cst_45 = arith.constant 0.000000e+00 : f32
    %129 = vector.broadcast %cst_45 : f32 to vector<8x1xf32>
    %130 = vector.extract_strided_slice %97 {offsets = [0, 1], sizes = [8, 255], strides = [1, 1]} : vector<8x256xf32> to vector<8x255xf32>
    %131 = tpu.concatenate %130, %129 in 1 : vector<8x255xf32>, vector<8x1xf32> -> vector<8x256xf32>
    %c15_i32_46 = arith.constant 15 : i32
    %132 = vector.broadcast %c15_i32_46 : i32 to vector<1x256xi32>
    %133 = arith.cmpi slt, %18, %132 : vector<1x256xi32>
    %cst_47 = arith.constant 0.000000e+00 : f32
    %134 = vector.shape_cast %133 : vector<1x256xi1> to vector<1x256xi1>
    %135 = vector.broadcast %134 : vector<1x256xi1> to vector<8x256xi1>
    %136 = vector.broadcast %cst_47 : f32 to vector<8x256xf32>
    %137 = arith.select %135, %131, %136 : vector<8x256xi1>, vector<8x256xf32>
    %cst_48 = arith.constant 0.000000e+00 : f32
    %138 = vector.broadcast %cst_48 : f32 to vector<8x15xf32>
    %139 = vector.extract_strided_slice %97 {offsets = [0, 15], sizes = [8, 241], strides = [1, 1]} : vector<8x256xf32> to vector<8x241xf32>
    %140 = tpu.concatenate %139, %138 in 1 : vector<8x241xf32>, vector<8x15xf32> -> vector<8x256xf32>
    %c0_i32_49 = arith.constant 0 : i32
    %141 = vector.broadcast %c0_i32_49 : i32 to vector<1x256xi32>
    %142 = arith.cmpi sgt, %18, %141 : vector<1x256xi32>
    %cst_50 = arith.constant 0.000000e+00 : f32
    %143 = vector.shape_cast %142 : vector<1x256xi1> to vector<1x256xi1>
    %144 = vector.broadcast %143 : vector<1x256xi1> to vector<8x256xi1>
    %145 = vector.broadcast %cst_50 : f32 to vector<8x256xf32>
    %146 = arith.select %144, %140, %145 : vector<8x256xi1>, vector<8x256xf32>
    %cst_51 = arith.constant 0.000000e+00 : f32
    %147 = vector.broadcast %cst_51 : f32 to vector<8x16xf32>
    %148 = vector.extract_strided_slice %97 {offsets = [0, 16], sizes = [8, 240], strides = [1, 1]} : vector<8x256xf32> to vector<8x240xf32>
    %149 = tpu.concatenate %148, %147 in 1 : vector<8x240xf32>, vector<8x16xf32> -> vector<8x256xf32>
    %cst_52 = arith.constant 0.000000e+00 : f32
    %150 = vector.broadcast %cst_52 : f32 to vector<8x17xf32>
    %151 = vector.extract_strided_slice %97 {offsets = [0, 17], sizes = [8, 239], strides = [1, 1]} : vector<8x256xf32> to vector<8x239xf32>
    %152 = tpu.concatenate %151, %150 in 1 : vector<8x239xf32>, vector<8x17xf32> -> vector<8x256xf32>
    %c15_i32_53 = arith.constant 15 : i32
    %153 = vector.broadcast %c15_i32_53 : i32 to vector<1x256xi32>
    %154 = arith.cmpi slt, %18, %153 : vector<1x256xi32>
    %cst_54 = arith.constant 0.000000e+00 : f32
    %155 = vector.shape_cast %154 : vector<1x256xi1> to vector<1x256xi1>
    %156 = vector.broadcast %155 : vector<1x256xi1> to vector<8x256xi1>
    %157 = vector.broadcast %cst_54 : f32 to vector<8x256xf32>
    %158 = arith.select %156, %152, %157 : vector<8x256xi1>, vector<8x256xf32>
    %159 = tpu.concatenate %107, %110, %119, %128, %97, %137, %146, %149, %158, %98 in 0 : vector<8x256xf32>, vector<8x256xf32>, vector<8x256xf32>, vector<8x256xf32>, vector<8x256xf32>, vector<8x256xf32>, vector<8x256xf32>, vector<8x256xf32>, vector<8x256xf32>, vector<24x256xf32> -> vector<96x256xf32>
    %160 = arith.truncf %159 : vector<96x256xf32> to vector<96x256xbf16>
    %c1 = arith.constant 1 : index
    %c0_55 = arith.constant 0 : index
    %c0_56 = arith.constant 0 : index
    %161 = vector.load %arg2[%c1, %c0_55, %c0_56] : memref<2x64x96xbf16, #tpu.memory_space<vmem>>, vector<1x64x96xbf16>
    %162 = vector.shape_cast %161 : vector<1x64x96xbf16> to vector<64x96xbf16>
    %cst_57 = arith.constant dense<0.000000e+00> : vector<64x256xf32>
    %163 = tpu.matmul %162, %160, %cst_57 {dimension_numbers = #tpu.dot_dimension_numbers<[1], [0], [0], [1], [0, 0, 1, 1], [], []>} : vector<64x96xbf16>, vector<96x256xbf16>, vector<64x256xf32> -> vector<64x256xf32>
    %c1_58 = arith.constant 1 : index
    %c0_59 = arith.constant 0 : index
    %c0_60 = arith.constant 0 : index
    %164 = vector.load %arg3[%c1_58, %c0_59, %c0_60] : memref<2x64x1xf32, #tpu.memory_space<vmem>>, vector<1x64x1xf32>
    %165 = vector.shape_cast %164 : vector<1x64x1xf32> to vector<64x1xf32>
    %166 = vector.broadcast %165 : vector<64x1xf32> to vector<64x256xf32>
    %167 = arith.addf %163, %166 : vector<64x256xf32>
    %cst_61 = arith.constant 0.000000e+00 : f32
    %168 = vector.broadcast %cst_61 : f32 to vector<64x256xf32>
    %169 = arith.maximumf %167, %168 : vector<64x256xf32>
    %c1_62 = arith.constant 1 : index
    %c0_63 = arith.constant 0 : index
    %c0_64 = arith.constant 0 : index
    %170 = vector.load %arg4[%c1_62, %c0_63, %c0_64] : memref<2x32x64xbf16, #tpu.memory_space<vmem>>, vector<1x32x64xbf16>
    %171 = vector.shape_cast %170 : vector<1x32x64xbf16> to vector<32x64xbf16>
    %172 = arith.truncf %169 : vector<64x256xf32> to vector<64x256xbf16>
    %cst_65 = arith.constant dense<0.000000e+00> : vector<32x256xf32>
    %173 = tpu.matmul %171, %172, %cst_65 {dimension_numbers = #tpu.dot_dimension_numbers<[1], [0], [0], [1], [0, 0, 1, 1], [], []>} : vector<32x64xbf16>, vector<64x256xbf16>, vector<32x256xf32> -> vector<32x256xf32>
    %174 = arith.addf %96, %173 : vector<32x256xf32>
    %c0_66 = arith.constant 0 : index
    %c0_67 = arith.constant 0 : index
    %c0_68 = arith.constant 0 : index
    %175 = vector.load %arg5[%c0_66, %c0_67, %c0_68] : memref<1x32x256xf32, #tpu.memory_space<vmem>>, vector<1x32x256xf32>
    %176 = vector.shape_cast %175 : vector<1x32x256xf32> to vector<32x256xf32>
    %177 = vector.shape_cast %174 : vector<32x256xf32> to vector<1x32x256xf32>
    tpu.vector_store %arg5[%c0_66, %c0_67, %c0_68], %177 {strides = array<i32>} : memref<1x32x256xf32, #tpu.memory_space<vmem>>, vector<1x32x256xf32>,
    return
  }
  func.func @transform_0(%arg0: i32) -> (i32, i32, i32) {
    %c0_i32 = arith.constant 0 : i32
    %c0_i32_0 = arith.constant 0 : i32
    %c0_i32_1 = arith.constant 0 : i32
    return %arg0, %c0_i32, %c0_i32_0 : i32, i32, i32
  }
  func.func @transform_1(%arg0: i32) -> (i32, i32, i32) {
    %c0_i32 = arith.constant 0 : i32
    %c0_i32_0 = arith.constant 0 : i32
    %c0_i32_1 = arith.constant 0 : i32
    %c0_i32_2 = arith.constant 0 : i32
    return %c0_i32, %c0_i32_0, %c0_i32_1 : i32, i32, i32
  }
  func.func @transform_2(%arg0: i32) -> (i32, i32, i32) {
    %c0_i32 = arith.constant 0 : i32
    %c0_i32_0 = arith.constant 0 : i32
    %c0_i32_1 = arith.constant 0 : i32
    %c0_i32_2 = arith.constant 0 : i32
    return %c0_i32, %c0_i32_0, %c0_i32_1 : i32, i32, i32
  }
  func.func @transform_3(%arg0: i32) -> (i32, i32, i32) {
    %c0_i32 = arith.constant 0 : i32
    %c0_i32_0 = arith.constant 0 : i32
    %c0_i32_1 = arith.constant 0 : i32
    %c0_i32_2 = arith.constant 0 : i32
    return %c0_i32, %c0_i32_0, %c0_i32_1 : i32, i32, i32
  }
  func.func @transform_4(%arg0: i32) -> (i32, i32, i32) {
    %c0_i32 = arith.constant 0 : i32
    %c0_i32_0 = arith.constant 0 : i32
    %c0_i32_1 = arith.constant 0 : i32
    return %arg0, %c0_i32, %c0_i32_0 : i32, i32, i32
  }
}

</mosaic_0001>

<bundles_post_ra>
// kernel: tpu_custom_call.1
= control target key start
LH: loop header
LB: loop body
LE: loop exit
PB: predicated region body
PF: predicated region fallthrough
CT: control target
= control target key end

     0   :  { %9 = vsyncpa [#allocation3], 0  ;;  %s2035_s0 = inlined_call_operand.vmem [shape: f32[2,32,256], index: 0, kind: input, shape index: {}]   ;;  %s2036_s1 = inlined_call_operand.hbm [shape: bf16[2,64,96], index: 1, kind: input, shape index: {}]   ;;  %s2037_s2 = inlined_call_operand.vmem [shape: f32[2,64,1], index: 2, kind: input, shape index: {}]   ;;  %s2038_s3 = inlined_call_operand.hbm [shape: bf16[2,32,64], index: 3, kind: input, shape index: {}]   ;;  %s2039_s4 = inlined_call_operand.hbm [shape: f32[2,32,256], index: 4, kind: output, shape index: {}]  }
   0x1   :  { %10 = vsyncpa [#allocation6], 0 }
   0x2   :  { %11 = vsyncpa [#allocation4], 0 }
   0x3   :  { %13 = vsyncpa [#allocation4 + $0x1], 0  ;;  %s1547_s15 = smov 0   ;;  %s1549_s16 = smov 0  }
   0x4   :  { %s1551_s17 = smov 0   ;;  %s1553_s18 = smov 0  }
   0x5 LB: > { %s1568_s19 = sadd.s32 4294967295, %s1504_s18   ;;  %s1105_s20 = sadd.s32 4294967294, %s1504_s18   ;;  %s1504_s18 = sphi %s1553_s18, %s2121_s18   ;;  %s1500_s17 = sphi %s1551_s17, %s2120_s17   ;;  %s1496_s16 = sphi %s1549_s16, %s2119_s16   ;;  %s1492_s15 = sphi %s1547_s15, %s2118_s15  }
   0x6   : > { %s1572_s21 = sadd.s32 1, %s1504_s18   ;;  %s115_s22 = sadd.s32 1, %s1500_s17 }
   0x7   : > { %s112_s23 = ssub.s32 %s1504_s18, %s1572_s21  ;;  %p125_p0 = scmp.ne.s32.totalorder %s1500_s17, %s1496_s16 }
   0x8   : > { %p113_p1 = scmp.eq.s32.totalorder %s112_s23, 0  ;;  %p126_p2 = scmp.eq.s32.totalorder %s1568_s19, 1 }
   0x9   : > { %p131_p3 = scmp.ne.s32.totalorder %s1496_s16, %s1492_s15  ;;  %p132_p4 = scmp.eq.s32.totalorder %s1105_s20, 1 }
   0xa   : > { %s1583_s24 = scalar_select %p113_p1, %s1500_s17, %s115_s22  }
   0xb   : > { %p1585_p5 = por %p126_p2, %p125_p0  ;;  %p1589_p6 = por %p132_p4, %p131_p3 }
   0xc   : > { %p1106_p7 = scmp.ge.s32.totalorder %s1504_s18, 1  ;;  %p139_p8 = scmp.lt.s32.totalorder %s1504_s18, 3 }
   0xd   : > { %s2058_s26 = scalar_select %p1589_p6, 1, 0 }
   0xe   : > { %p2040_p9 = scmp.eq.s32.totalorder %s1568_s19, 0  ;;  %p1596_p10 = pnand %p1106_p7, %p139_p8 }
   0xf   : > { %s1506_s28 = smov [#allocation2]   ;;  %s1507_s5 = smov [#allocation5]  }
  0x10   : > { %s151_s29 = sshll.u32 %s1506_s28, 4  ;;  %p1227_p11 = pneg %p1596_p10  ;;  %s152_s29 = int_to_ptr.vmem [resolvable:$true] %s151_s29 }
  0x11   : > { %s167_s6 = sshll.u32 %s1507_s5, 4  ;;  %s1395_s7 = scalar_lea.vmem %s152_s29, 1024  ;;  %s168_s6 = int_to_ptr.vmem [resolvable:$true] %s167_s6 }
  0x12   : > { %p1604_p12 = pnand %p2040_p9, %p1227_p11  ;;  %p1396_p0 = scmp.ne.s32.totalorder %s152_s29, %s1395_s7 }
  0x13   : > { %p1403_p3 = scmp.lt.s32.totalorder %s152_s29, %s152_s29  ;;  %p1404_p4 = scmp.lt.s32.totalorder %s1395_s7, %s1395_s7 }
  0x14   : > { %p1386_p13 = pneg %p1604_p12 }
  0x15   : > { %p1405_p7 = por %p1404_p4, %p1403_p3 }
  0x16   : > { %p1398_p1 = pnand %p1396_p0, %p1386_p13 }
  0x18   : > { %p1399_p2 = pneg %p1398_p1 }
  0x1a   : > { %p1406_p8 = pnand %p1405_p7, %p1399_p2 }
  0x1c   : > { %1409 = shalt.err (!%p1406_p8)
}
  0x1d   : > { %s1508_s8 = smov 64   ;;  %s1509_s9 = smov 4  }
  0x1e   : > { %1230 = dma.hbm_to_vmem [thread:$0]  (!%p1604_p12), %s2036_s1, 1024, %s152_s29, [#allocation3], %s1508_s8, %s1508_s8, %s1509_s9  }
  0x1f   : > { %s1421_s12 = scalar_lea.vmem %s168_s6, 512  ;;  %p1429_p9 = scmp.lt.s32.totalorder %s168_s6, %s168_s6 }
  0x20   : > { %p1422_p11 = scmp.ne.s32.totalorder %s168_s6, %s1421_s12  ;;  %p1430_p6 = scmp.lt.s32.totalorder %s1421_s12, %s1421_s12 }
  0x22   : > { %p1424_p0 = pnand %p1422_p11, %p1386_p13  ;;  %p1431_p3 = por %p1430_p6, %p1429_p9 }
  0x24   : > { %p1425_p1 = pneg %p1424_p0 }
  0x26   : > { %p1432_p2 = pnand %p1431_p3, %p1425_p1 }
  0x28   : > { %1435 = shalt.err (!%p1432_p2)
}
  0x29   : > { %1233 = dma.hbm_to_vmem [thread:$0]  (!%p1604_p12), %s2038_s3, 512, %s168_s6, [#allocation6], %s1508_s8, %s1508_s8, %s1509_s9  }
  0x2a   : > { %191 = sbr.rel (%p1596_p10) target bundleno = 1252 (0x4e4), region = 36  ;;  %p2061_p4 = scmp.eq.s32.totalorder (!%p1596_p10), %s1568_s19, 0 }
  0x2f   : > { %1479 = dma.done.wait (%p2061_p4), [#allocation3], 1024   ;;  %p2062_p13 = pmov %p2061_p4 }
  0x30   : > { %p2063_p7 = pmov %p2061_p4 }
  0x31   : > { %1481 = vsyncadd (%p2062_p13), [#allocation3], 4294966272 }
  0x32   : > { %1483 = dma.done.wait (%p2063_p7), [#allocation6], 512   ;;  %p2064_p6 = pmov %p2061_p4 }
  0x33   : > { %p221_p9 = scmp.lt.s32.totalorder %s1568_s19, 1  ;;  %s1510_s29 = smov 111   ;;  %v1516_v10 = vmov 0   ;;  %v387_v11 = vld [vmem:[%s2037_s2 + $0x38] sm:$0xff]  ;;  %v386_v12 = vld [vmem:[%s2037_s2 + $0x30] sm:$0xff]  ;;  %v384_v13 = vld [vmem:[%s2037_s2 + $0x20] sm:$0xff]  ;;  %v235_v19 = vlaneseq }
  0x34   : > { %1485 = vsyncadd (%p2064_p6), [#allocation6], 4294966784  ;;  %s1511_s30 = smov 112   ;;  %s1512_s5 = smov 113   ;;  %493 = vmatprep.mubr.bf16.mxu0 %v1516_v10  ;;  %1331 = vset.pattern.permute.xlu1 %v1516_v10  ;;  %v385_v14 = vld [vmem:[%s2037_s2 + $0x28] sm:$0xff]  ;;  %v382_v15 = vld [vmem:[%s2037_s2 + $0x10] sm:$0xff] }
  0x35   : > { %s222_s20 = scalar_select %p221_p9, %s1568_s19, 1  ;;  %1330 = vset.pattern.permute.xlu0 %v1516_v10  ;;  %611 = vmatprep.mubr.bf16.mxu1 %v1516_v10  ;;  %v383_v16 = vld [vmem:[%s2037_s2 + $0x18] sm:$0xff]  ;;  %v380_v17 = vld [vmem:[%s2037_s2] sm:$0xff]  ;;  %v381_v18 = vld [vmem:[%s2037_s2 + $0x8] sm:$0xff]  ;;  %v236_v20 = vand.u32 127, %v235_v19  ;;  %vm2049_vm0 = vcmask 908288  }
  0x36   : > { %s1513_s6 = smov 127   ;;  %s1514_s7 = smov 15   ;;  %v2065_v26 = vmov 0  ;;  %vm2044_vm3 = vcmask 916480   ;;  %vm2046_vm4 = vcmask 924672   ;;  %vm1519_vm5 = vmmov 1  }
  0x37   : > { %s1215_s22 = sshll.u32 %s222_s20, 6  ;;  %s1515_s8 = smov 1   ;;  %v237_v21 = vadd.s32 128, %v236_v20  ;;  %v242_v23 = vand.u32 15, %v236_v20  ;;  %vm2045_vm7 = vcmask 1039360   ;;  %vm2047_vm11 = vcmask 121856  }
  0x38   : > { %s1641_s28 = scalar_lea.vmem %s2035_s0, %s1215_s22  ;;  %s2041_s9 = smov 17   ;;  %vm2048_vm13 = vcmask 7168   ;;  %v1380_v27 = vld [vmem:[#allocation2 + $0x30] sm:$0xff]   ;;  %v1381_v43 = vld [vmem:[#allocation2 + $0x38] sm:$0xff]  }
  0x39   : > { %v1644_v0 = vld [vmem:[%s1641_s28] sm:$0xff]  ;;  %v1647_v1 = vld [vmem:[%s1641_s28 + $0x8] sm:$0xff]  ;;  %v1657_v5 = vld [vmem:[%s1641_s28 + $0x38] sm:$0xff]  ;;  %s2042_s10 = smov 16   ;;  %v249_v22 = vand.u32 15, %v237_v21  ;;  %vm1709_vm2 = vcmp.lt.s32.totalorder %v242_v23, 15 }
  0x3a   : > { %v1290_v2 = vpack.i.bf16 %v1644_v0, %v1647_v1  ;;  %v1300_v3 = vpack.i.bf16 %v1647_v1, %v1644_v0  ;;  %v1654_v4 = vld [vmem:[%s1641_s28 + $0x28] sm:$0xff]  ;;  %v1660_v6 = vld [vmem:[%s1641_s28 + $0x20] sm:$0xff]  ;;  %v1663_v7 = vld [vmem:[%s1641_s28 + $0x30] sm:$0xff]  ;;  %vm1728_vm8 = vcmp.gt.s32.totalorder %v242_v23, 0  ;;  %s1520_s11 = smov [#allocation7]  }
  0x3b   : > { %v371_v8 = vpack.c.bf16 %v1657_v5, %v1654_v4  ;;  %v370_v9 = vpack.c.bf16 %v1663_v7, %v1660_v6  ;;  %vm1705_vm1 = vcmp.lt.s32.totalorder %v249_v22, 15  ;;  %v1714_v28 = vld [vmem:[%s1641_s28 + $0x10] sm:$0xff]  ;;  %v1717_v29 = vld [vmem:[%s1641_s28 + $0x18] sm:$0xff]  ;;  %vm1737_vm9 = vmpackc.low %vm1519_vm5, %vm1709_vm2  ;;  %vm1741_vm10 = vcmp.gt.s32.totalorder %v249_v22, 0  ;;  %s2091_s28 = smov 16   ;;  %s1440_s12 = sshll.u32 %s1520_s11, 4  ;;  %s1441_s12 = int_to_ptr.vmem [resolvable:$false] %s1440_s12 }
  0x3c   : > { %1291 = vrot.lane.b32.xlu0 %v1290_v2, %s1510_s29  ;;  %1301 = vrot.lane.b32.xlu1 %v1300_v3, %s1511_s30  ;;  %v2066_v26 = vsel %vm1705_vm1, 4294967295, %v2065_v26  ;;  %vm1724_vm6 = vmpackc.low %vm1519_vm5, %vm1705_vm1  ;;  %s1442_s13 = scalar_lea.vmem %s1441_s12, 2048 }
  0x3d   : > { %465 = vmatprep.subr.bf16.mxu0 %v371_v8  ;;  %vm1756_vm12 = vmpackc.low %vm2044_vm3, %vm1741_vm10 }
  0x3e   : > { %466 = vmatpush1.bf16.msra.mxu0 %v370_v9  ;;  %vm1765_vm14 = vmpackc.low %vm1519_vm5, %vm1728_vm8 }
  0x3f   : > { %vm1772_vm15 = vmpackc.low %vm1705_vm1, %vm1519_vm5 }
  0x40   : > { %1296 = vrot.lane.b32.xlu0 %v1290_v2, %s1512_s5  ;;  %1306 = vrot.lane.b32.xlu1 %v1290_v2, %s1513_s6 }
  0x44   : > { %1311 = vrot.lane.b32.xlu0 %v1300_v3, %s1514_s7  ;;  %1316 = vrot.lane.b32.xlu1 %v1300_v3, %s1515_s8 }
  0x48   : > { %1321 = vrot.lane.b32.xlu0 %v1300_v3, %s2041_s9  ;;  %1326 = vrot.lane.b32.xlu1 %v1300_v3, %s2042_s10 }
  0x4c   : > { %425 = vperm.xlu1 %1331, %v387_v11   ;;  %420 = vperm.xlu0 %1330, %v386_v12  }
  0x50   : > { %410 = vperm.xlu1 %1331, %v384_v13   ;;  %415 = vperm.xlu0 %1330, %v385_v14  }
  0x54   : > { %400 = vperm.xlu1 %1331, %v382_v15   ;;  %405 = vperm.xlu0 %1330, %v383_v16  }
  0x58   : > { %390 = vperm.xlu1 %1331, %v380_v17   ;;  %395 = vperm.xlu0 %1330, %v381_v18  }
  0xae   : > { %v1292_v24 = vpop.permute.xlu0 %1291  ;;  %v1302_v25 = vpop.permute.xlu1 %1301 }
  0xaf   : > { %v1294_v30 = vunpack.i.h.bf16 %v1292_v24  ;;  %v1293_v31 = vunpack.i.l.bf16 %v1292_v24  ;;  %v1304_v32 = vunpack.i.h.bf16 %v1302_v25  ;;  %v1303_v33 = vunpack.i.l.bf16 %v1302_v25 }
  0xb1   : > { %v354_v34 = vsel %vm2049_vm0, %v1294_v30, %v1293_v31  ;;  %v357_v35 = vsel %vm2049_vm0, %v1293_v31, 0.0  ;;  %v345_v44 = vsel %vm2044_vm3, %v1303_v33, %v1304_v32  ;;  %vm2050_vm3 = vcmask 138240   ;;  %vm1814_vm0 = vmpackc.low %vm1519_vm5, %vm1741_vm10  ;;  %v1372_v33 = vld [vmem:[#allocation2] sm:$0xff]  }
  0xb2   : > { %v1121_v38 = vpack.c.bf16 %v1717_v29, %v357_v35  ;;  %v1124_v39 = vpack.c.bf16 %v1714_v28, %v354_v34  ;;  %v1297_v40 = vpop.permute.xlu0 %1296  ;;  %v1307_v42 = vpop.permute.xlu1 %1306  ;;  %v1373_v34 = vld [vmem:[#allocation2 + $0x8] sm:$0xff]   ;;  %v1374_v35 = vld [vmem:[#allocation2 + $0x10] sm:$0xff]  }
  0xb3   : > { %v1299_v45 = vunpack.i.h.bf16 %v1297_v40  ;;  %v1298_v46 = vunpack.i.l.bf16 %v1297_v40  ;;  %v1309_v47 = vunpack.i.h.bf16 %v1307_v42  ;;  %v1308_v48 = vunpack.i.l.bf16 %v1307_v42 }
  0xb4   : > { %1122 = vmatprep.subr.msk.bf16.mxu0 %vm1724_vm6, %v1121_v38  ;;  %v1375_v38 = vld [vmem:[#allocation2 + $0x18] sm:$0xff]  }
  0xb5   : > { %v334_v49 = vsel %vm2046_vm4, %v1299_v45, %v1298_v46  ;;  %v337_v50 = vsel %vm2046_vm4, %v1298_v46, 0.0  ;;  %1125 = vmatpush1.bf16.msk.msra.mxu0 %vm1737_vm9, %v1124_v39  ;;  %v326_v51 = vsel %vm2045_vm7, %v1308_v48, 0.0  ;;  %v323_v54 = vsel %vm2045_vm7, %v1309_v47, %v1308_v48  ;;  %vm1790_vm7 = vmpackc.low %vm1709_vm2, %vm1519_vm5 }
  0xb6   : > { %v1127_v53 = vpack.c.bf16 %v1304_v32, %v337_v50  ;;  %v1133_v55 = vpack.c.bf16 %v326_v51, %v1647_v1  ;;  %v1312_v56 = vpop.permute.xlu0 %1311  ;;  %v1130_v58 = vpack.c.bf16 %v345_v44, %v334_v49  ;;  %v1317_v59 = vpop.permute.xlu1 %1316  ;;  %v1136_v3 = vpack.c.bf16 %v323_v54, %v1644_v0 }
  0xb7   : > { %v1314_v60 = vunpack.i.h.bf16 %v1312_v56  ;;  %v1313_v61 = vunpack.i.l.bf16 %v1312_v56  ;;  %v1319_v62 = vunpack.i.h.bf16 %v1317_v59  ;;  %v1318_v63 = vunpack.i.l.bf16 %v1317_v59 }
  0xb8   : > { %1128 = vmatprep.subr.msk.bf16.mxu0 %vm1756_vm12, %v1127_v53  ;;  %vm2056_vm4 = vcmask 130048  }
  0xb9   : > { %v295_v8 = vsel %vm2047_vm11, %v1313_v61, %v1314_v60  ;;  %1131 = vmatpush1.bf16.msk.msra.mxu0 %vm1765_vm14, %v1130_v58  ;;  %v312_v9 = vsel %vm2048_vm13, %v1318_v63, %v1319_v62  ;;  %v298_v11 = vsel %vm2047_vm11, 0.0, %v1313_v61  ;;  %v315_v12 = vsel %vm2048_vm13, 0.0, %v1318_v63  ;;  %vm2055_vm11 = vmpackc.low %vm1741_vm10, %vm1705_vm1 }
  0xba   : > { %v1139_v13 = vpack.c.bf16 %v312_v9, %v295_v8  ;;  %1134 = vmatprep.subr.msk.bf16.mxu0 %vm1772_vm15, %v1133_v55  ;;  %v1322_v14 = vpop.permute.xlu0 %1321  ;;  %v1327_v16 = vpop.permute.xlu1 %1326  ;;  %v1142_v21 = vpack.c.bf16 %v315_v12, %v298_v11  ;;  %vm2089_vm13 = vcmask 138240   ;;  %vm2090_vm1 = vmpackc.low %vm1728_vm8, %vm1709_vm2 }
  0xbb   : > { %v1324_v17 = vunpack.i.h.bf16 %v1322_v14  ;;  %v1323_v18 = vunpack.i.l.bf16 %v1322_v14  ;;  %v1329_v19 = vunpack.i.h.bf16 %v1327_v16  ;;  %v1328_v20 = vunpack.i.l.bf16 %v1327_v16 }
  0xbd   : > { %v269_v22 = vsel %vm2050_vm3, %v1323_v18, %v1324_v17  ;;  %1137 = vmatpush1.bf16.msk.msra.mxu0 %vm1790_vm7, %v1136_v3  ;;  %v286_v23 = vsel %vm2056_vm4, %v1328_v20, %v1329_v19  ;;  %vm1819_vm3 = vmneg %vm2056_vm4  ;;  %v272_v31 = vsel %vm2089_vm13, 0.0, %v1323_v18  ;;  %vm2053_vm13 = vcmask 785408  }
  0xbe   : > { %v1145_v24 = vpack.c.bf16 %v286_v23, %v269_v22  ;;  %1140 = vmatprep.subr.msk.bf16.mxu0 %vm2055_vm11, %v1139_v13  ;;  %vm2054_vm5 = vmpackc.low %vm1819_vm3, %vm1728_vm8  ;;  %v1149_v32 = vpack.c.bf16 %v1328_v20, %v272_v31 }
  0xc1   : > { %1143 = vmatpush1.bf16.msk.msra.mxu0 %vm2090_vm1, %v1142_v21  ;;  %vm2052_vm1 = vcmask 523264  }
  0xc2   : > { %1146 = vmatprep.subr.msk.bf16.mxu0 %vm1814_vm0, %v1145_v24 }
  0xc5   : > { %1150 = vmatpush1.bf16.msk.msra.mxu0 %vm2054_vm5, %v1149_v32  ;;  %vm2095_vm5 = vcmask 924672  }
  0xc6   : > { %vm2096_vm11 = vmmov %vm2095_vm5 }
  0xc7   : > { %v421_v50 = vpop.permute.xlu0 %420  ;;  %v426_v53 = vpop.permute.xlu1 %425 }
  0xc8   : > { %1151 = vmatmul.mubr.msk.bf16.vlgmr.msra.gmra.mxu0 %vm2053_vm13, %v1372_v33 }
  0xc9   : > { %503 = vmatprep.mubr.bf16.mxu0 %v1516_v10 }
  0xcb   : > { %v416_v56 = vpop.permute.xlu0 %415  ;;  %v411_v59 = vpop.permute.xlu1 %410 }
  0xcf   : > { %v406_v8 = vpop.permute.xlu0 %405  ;;  %v401_v14 = vpop.permute.xlu1 %400 }
  0xd0   : > { %1152 = vmatmul.mubr.msk.bf16.gmra.mxu0 %vm2053_vm13, %v1373_v34 }
  0xd1   : > { %513 = vmatprep.mubr.bf16.mxu0 %v1516_v10 }
  0xd3   : > { %v396_v33 = vpop.permute.xlu0 %395 }
  0xd8   : > { %1153 = vmatmul.mubr.msk.bf16.gmra.mxu0 %vm2053_vm13, %v1374_v35 }
  0xd9   : > { %523 = vmatprep.mubr.bf16.mxu0 %v1516_v10 }
  0xe0   : > { %1154 = vmatmul.mubr.msk.bf16.gmra.mxu0 %vm2053_vm13, %v1375_v38 }
  0xe1   : > { %970 = vmatprep.mubr.bf16.mxu0 %v1516_v10 }
 0x188   : > { %v495_v39 = vpop.f32.mrf.mxu0 }
 0x18a   : > { %v497_v40 = vpop.f32.mrf.mxu0 }
 0x18c   : > { %v499_v42 = vpop.f32.mrf.mxu0 }
 0x18e   : > { %v501_v44 = vpop.f32.mrf.mxu0 }
 0x190   : > { %v505_v45 = vpop.f32.mrf.mxu0 }
 0x192   : > { %v507_v46 = vpop.f32.mrf.mxu0 }
 0x193   : > { %v508_v24 = vadd.f32 %v507_v46, %v401_v14 }
 0x194   : > { %v509_v47 = vpop.f32.mrf.mxu0 }
 0x195   : > { %v510_v34 = vadd.f32 %v509_v47, %v406_v8 }
 0x196   : > { %v511_v48 = vpop.f32.mrf.mxu0 }
 0x197   : > { %v512_v18 = vadd.f32 %v511_v48, %v406_v8 }
 0x198   : > { %v515_v49 = vpop.f32.mrf.mxu0 }
 0x199   : > { %v516_v22 = vadd.f32 %v515_v49, %v411_v59  ;;  %v500_v49 = vadd.f32 %v499_v42, %v396_v33  ;;  %v1377_v42 = vld [vmem:[#allocation5 + $0x8] sm:$0xff]  }
 0x19a   : > { %v517_v51 = vpop.f32.mrf.mxu0 }
 0x19b   : > { %v518_v12 = vadd.f32 %v517_v51, %v411_v59  ;;  %v540_v59 = vmax.f32 %v510_v34, 0.0  ;;  %v1161_v34 = vld [vmem:[%s2037_s2 + $0x50] sm:$0xff] }
 0x19c   : > { %v519_v54 = vpop.f32.mrf.mxu0 }
 0x19d   : > { %v520_v16 = vadd.f32 %v519_v54, %v416_v56  ;;  %v543_v31 = vmax.f32 %v518_v12, 0.0  ;;  %v506_v54 = vadd.f32 %v505_v45, %v401_v14 }
 0x19e   : > { %v521_v55 = vpop.f32.mrf.mxu0 }
 0x19f   : > { %v522_v62 = vadd.f32 %v521_v55, %v416_v56  ;;  %v544_v35 = vmax.f32 %v520_v16, 0.0  ;;  %v541_v55 = vmax.f32 %v512_v18, 0.0  ;;  %v542_v56 = vmax.f32 %v516_v22, 0.0 }
 0x1a0   : > { %v525_v58 = vpop.f32.mrf.mxu0  ;;  %v538_v47 = vmax.f32 %v506_v54, 0.0 }
 0x1a1   : > { %v526_v9 = vadd.f32 %v525_v58, %v421_v50  ;;  %v545_v19 = vmax.f32 %v522_v62, 0.0  ;;  %v539_v58 = vmax.f32 %v508_v24, 0.0  ;;  %v558_v46 = vpack.c.bf16 %v544_v35, %v542_v56  ;;  %v1160_v35 = vld [vmem:[%s2037_s2 + $0x48] sm:$0xff] }
 0x1a2   : > { %v527_v60 = vpop.f32.mrf.mxu0 }
 0x1a3   : > { %v528_v63 = vadd.f32 %v527_v60, %v421_v50  ;;  %v546_v23 = vmax.f32 %v526_v9, 0.0  ;;  %v502_v50 = vadd.f32 %v501_v44, %v396_v33  ;;  %v559_v51 = vpack.c.bf16 %v545_v19, %v543_v31  ;;  %v1162_v33 = vld [vmem:[%s2037_s2 + $0x58] sm:$0xff] }
 0x1a4   : > { %v529_v61 = vpop.f32.mrf.mxu0  ;;  %v536_v44 = vmax.f32 %v500_v49, 0.0 }
 0x1a5   : > { %v530_v3 = vadd.f32 %v529_v61, %v426_v53  ;;  %v547_v20 = vmax.f32 %v528_v63, 0.0  ;;  %v537_v60 = vmax.f32 %v502_v50, 0.0  ;;  %v557_v61 = vpack.c.bf16 %v541_v55, %v539_v58 }
 0x1a6   : > { %v531_v11 = vpop.f32.mrf.mxu0 }
 0x1a7   : > { %v532_v13 = vadd.f32 %v531_v11, %v426_v53  ;;  %v548_v17 = vmax.f32 %v530_v3, 0.0  ;;  %v391_v53 = vpop.permute.xlu1 %390  ;;  %v556_v3 = vpack.c.bf16 %v540_v59, %v538_v47 }
 0x1a8   : > { %v498_v48 = vadd.f32 %v497_v40, %v391_v53  ;;  %v496_v62 = vadd.f32 %v495_v39, %v391_v53  ;;  %v1376_v40 = vld [vmem:[#allocation5] sm:$0xff]  }
 0x1a9   : > { %v549_v21 = vmax.f32 %v532_v13, 0.0  ;;  %v560_v38 = vpack.c.bf16 %v548_v17, %v546_v23 }
 0x1aa   : > { %v535_v63 = vmax.f32 %v498_v48, 0.0  ;;  %v534_v9 = vmax.f32 %v496_v62, 0.0 }
 0x1ab   : > { %v561_v32 = vpack.c.bf16 %v549_v21, %v547_v20 }
 0x1ac   : > { %v555_v8 = vpack.c.bf16 %v537_v60, %v535_v63  ;;  %v554_v45 = vpack.c.bf16 %v536_v44, %v534_v9 }
 0x1ad   : > { %587 = vmatprep.subr.bf16.mxu1 %v561_v32  ;;  %v1163_v32 = vld [vmem:[%s2037_s2 + $0x60] sm:$0xff] }
 0x1ae   : > { %588 = vmatpush1.bf16.msra.mxu1 %v560_v38  ;;  %v1159_v38 = vld [vmem:[%s2037_s2 + $0x40] sm:$0xff] }
 0x1af   : > { %589 = vmatprep.subr.bf16.mxu1 %v559_v51 }
 0x1b2   : > { %590 = vmatpush1.bf16.msra.mxu1 %v558_v46 }
 0x1b3   : > { %591 = vmatprep.subr.bf16.mxu1 %v557_v61 }
 0x1b6   : > { %592 = vmatpush1.bf16.msra.mxu1 %v556_v3 }
 0x1b7   : > { %593 = vmatprep.subr.bf16.mxu1 %v555_v8 }
 0x1ba   : > { %594 = vmatpush1.bf16.msra.mxu1 %v554_v45 }
 0x1bd   : > { %1157 = vmatmul.mubr.msk.bf16.vlgmr.msra.gmra.mxu1 %vm2052_vm1, %v1376_v40 }
 0x1be   : > { %621 = vmatprep.mubr.bf16.mxu1 %v1516_v10 }
 0x1c5   : > { %1158 = vmatmul.mubr.msk.bf16.gmra.mxu1 %vm2052_vm1, %v1377_v42  ;;  %vm2093_vm1 = vcmask 908288  }
 0x1c6   : > { %852 = vmatprep.mubr.bf16.mxu1 %v1516_v10  ;;  %vm2094_vm13 = vmmov %vm2093_vm1 }
 0x27d   : > { %v613_v39 = vpop.f32.mrf.mxu1 }
 0x27e   : > { %v1853_v12 = vadd.f32 %v613_v39, %v1644_v0 }
 0x27f   : > { %v615_v11 = vpop.f32.mrf.mxu1 }
 0x280   : > { %v1856_v13 = vadd.f32 %v615_v11, %v1647_v1 }
 0x281   : > { %v617_v14 = vpop.f32.mrf.mxu1 }
 0x282   : > { %v1337_v16 = vpack.i.bf16 %v1853_v12, %v1856_v13  ;;  %v1342_v19 = vpack.i.bf16 %v1856_v13, %v1853_v12  ;;  %v1911_v54 = vadd.f32 %v617_v14, %v1714_v28 }
 0x283   : > { %v619_v17 = vpop.f32.mrf.mxu1 }
 0x284   : > { %1338 = vrot.lane.b32.xlu0 %v1337_v16, %s1512_s5  ;;  %1333 = vrot.lane.b32.xlu1 %v1337_v16, %s1510_s29  ;;  %s2092_s29 = smov 17   ;;  %v1914_v56 = vadd.f32 %v619_v17, %v1717_v29 }
 0x285   : > { %v623_v18 = vpop.f32.mrf.mxu1 }
 0x286   : > { %v1867_v1 = vadd.f32 %v623_v18, %v1660_v6 }
 0x287   : > { %v625_v20 = vpop.f32.mrf.mxu1 }
 0x288   : > { %1348 = vrot.lane.b32.xlu0 %v1337_v16, %s1513_s6  ;;  %1343 = vrot.lane.b32.xlu1 %v1342_v19, %s1511_s30  ;;  %v1870_v21 = vadd.f32 %v625_v20, %v1654_v4  ;;  %v1166_v4 = vld [vmem:[%s2037_s2 + $0x78] sm:$0xff]  ;;  %s218_s30 = sand.u32 1, %s1496_s16  }
 0x289   : > { %v627_v0 = vpop.f32.mrf.mxu1  ;;  %s1113_s5 = sshll.u32 %s218_s30, 6 }
 0x28a   : > { %v1873_v22 = vadd.f32 %v627_v0, %v1663_v7  ;;  %v1165_v7 = vld [vmem:[%s2037_s2 + $0x70] sm:$0xff]  ;;  %s220_s6 = scalar_lea.vmem [#allocation7], %s1113_s5 }
 0x28b   : > { %v629_v23 = vpop.f32.mrf.mxu1 }
 0x28c   : > { %1358 = vrot.lane.b32.xlu0 %v1342_v19, %s1515_s8  ;;  %1353 = vrot.lane.b32.xlu1 %v1342_v19, %s1514_s7  ;;  %v1878_v24 = vadd.f32 %v629_v23, %v1657_v5  ;;  %v728_v31 = vpack.c.bf16 %v1873_v22, %v1867_v1  ;;  %v1164_v5 = vld [vmem:[%s2037_s2 + $0x68] sm:$0xff]  ;;  %s1021_s8 = sshll.u32 %s220_s6, 4  ;;  %s1216_s7 = sshll.u32 %s1568_s19, 10  ;;  %s1984_s8 = int_to_ptr.vmem [resolvable:$true] %s1021_s8 }
 0x28d   : > { %s1990_s23 = scalar_lea.hbm %s2039_s4, %s1216_s7  ;;  %s1994_s19 = scalar_lea.sflag [#allocation4], %s218_s30 }
 0x28e   : > { %v729_v6 = vpack.c.bf16 %v1878_v24, %v1870_v21  ;;  %s1436_s27 = scalar_lea.vmem %s1984_s8, 1024  ;;  %p1443_p11 = scmp.lt.s32.totalorder %s1984_s8, %s1441_s12 }
 0x28f   : > { %p1437_p10 = scmp.ne.s32.totalorder %s1984_s8, %s1436_s27  ;;  %p1444_p0 = scmp.lt.s32.totalorder %s1442_s13, %s1436_s27 }
 0x290   : > { %1368 = vrot.lane.b32.xlu0 %v1342_v19, %s2091_s28  ;;  %1363 = vrot.lane.b32.xlu1 %v1342_v19, %s2092_s29 }
 0x291   : > { %824 = vmatprep.subr.bf16.mxu1 %v729_v6  ;;  %p1438_p12 = pnand %p1437_p10, %p1585_p5  ;;  %p1445_p1 = por %p1444_p0, %p1443_p11 }
 0x292   : > { %825 = vmatpush1.bf16.msra.mxu1 %v728_v31 }
 0x293   : > { %p1439_p8 = pneg %p1438_p12 }
 0x294   : > { %785 = vperm.xlu0 %1330, %v1166_v4   ;;  %780 = vperm.xlu1 %1331, %v1165_v7  }
 0x295   : > { %p1446_p3 = pnand %p1445_p1, %p1439_p8 }
 0x298   : > { %775 = vperm.xlu0 %1330, %v1164_v5   ;;  %770 = vperm.xlu1 %1331, %v1163_v32  }
 0x29c   : > { %765 = vperm.xlu0 %1330, %v1162_v33   ;;  %760 = vperm.xlu1 %1331, %v1161_v34  }
 0x2a0   : > { %755 = vperm.xlu0 %1330, %v1160_v35   ;;  %750 = vperm.xlu1 %1331, %v1159_v38   ;;  %v1378_v38 = vld [vmem:[#allocation2 + $0x20] sm:$0xff]  }
 0x2f6   : > { %v1339_v50 = vpop.permute.xlu0 %1338  ;;  %v1334_v55 = vpop.permute.xlu1 %1333 }
 0x2f7   : > { %v1336_v51 = vunpack.i.h.bf16 %v1334_v55  ;;  %v1335_v53 = vunpack.i.l.bf16 %v1334_v55  ;;  %v1340_v48 = vunpack.i.l.bf16 %v1339_v50  ;;  %v1341_v58 = vunpack.i.h.bf16 %v1339_v50 }
 0x2f9   : > { %v712_v49 = vsel %vm2093_vm1, %v1336_v51, %v1335_v53  ;;  %v715_v59 = vsel %vm2094_vm13, %v1335_v53, 0.0  ;;  %v697_v3 = vsel %vm2095_vm5, %v1340_v48, 0.0  ;;  %v694_v29 = vsel %vm2096_vm11, %v1341_v58, %v1340_v48 }
 0x2fa   : > { %v1172_v46 = vpack.c.bf16 %v1914_v56, %v715_v59  ;;  %v1175_v60 = vpack.c.bf16 %v1911_v54, %v712_v49  ;;  %v1349_v61 = vpop.permute.xlu0 %1348  ;;  %v1344_v62 = vpop.permute.xlu1 %1343  ;;  %vm2097_vm1 = vcmask 1039360   ;;  %vm2098_vm13 = vcmask 916480  }
 0x2fb   : > { %v1351_v47 = vunpack.i.h.bf16 %v1349_v61  ;;  %v1350_v63 = vunpack.i.l.bf16 %v1349_v61  ;;  %v1346_v44 = vunpack.i.h.bf16 %v1344_v62  ;;  %v1345_v28 = vunpack.i.l.bf16 %v1344_v62  ;;  %vm2099_vm4 = vmmov %vm2097_vm1 }
 0x2fc   : > { %1173 = vmatprep.subr.msk.bf16.mxu1 %vm1724_vm6, %v1172_v46  ;;  %vm2100_vm6 = vcmask 7168   ;;  %vm2101_vm11 = vcmask 121856   ;;  %vm2105_vm5 = vcmask 138240  }
 0x2fd   : > { %v687_v8 = vsel %vm2097_vm1, %v1350_v63, 0.0  ;;  %v1178_v9 = vpack.c.bf16 %v1346_v44, %v697_v3  ;;  %v704_v45 = vsel %vm2098_vm13, %v1345_v28, %v1346_v44  ;;  %1176 = vmatpush1.bf16.msk.msra.mxu1 %vm1737_vm9, %v1175_v60  ;;  %v684_v40 = vsel %vm2099_vm4, %v1351_v47, %v1350_v63  ;;  %vm2102_vm4 = vmmov %vm2100_vm6 }
 0x2fe   : > { %v1181_v42 = vpack.c.bf16 %v704_v45, %v694_v29  ;;  %v1359_v39 = vpop.permute.xlu0 %1358  ;;  %v1354_v11 = vpop.permute.xlu1 %1353  ;;  %v1184_v18 = vpack.c.bf16 %v687_v8, %v1856_v13  ;;  %v1187_v41 = vpack.c.bf16 %v684_v40, %v1853_v12  ;;  %vm2103_vm9 = vmmov %vm2101_vm11 }
 0x2ff   : > { %v1361_v14 = vunpack.i.h.bf16 %v1359_v39  ;;  %v1360_v16 = vunpack.i.l.bf16 %v1359_v39  ;;  %v1356_v17 = vunpack.i.h.bf16 %v1354_v11  ;;  %v1355_v36 = vunpack.i.l.bf16 %v1354_v11  ;;  %1179 = vmatprep.subr.msk.bf16.mxu1 %vm1756_vm12, %v1178_v9  ;;  %vm2108_vm1 = vmmov %vm2105_vm5 }
 0x300   : > { %vm2104_vm12 = vcmask 130048   ;;  %vm2109_vm13 = vmpackc.low %vm1728_vm8, %vm1709_vm2 }
 0x301   : > { %v674_v19 = vsel %vm2100_vm6, %v1360_v16, %v1361_v14  ;;  %v664_v20 = vsel %vm2101_vm11, %v1355_v36, %v1356_v17  ;;  %1182 = vmatpush1.bf16.msk.msra.mxu1 %vm1765_vm14, %v1181_v42  ;;  %v677_v7 = vsel %vm2102_vm4, 0.0, %v1360_v16  ;;  %v667_v5 = vsel %vm2103_vm9, 0.0, %v1355_v36 }
 0x302   : > { %v1369_v0 = vpop.permute.xlu0 %1368  ;;  %v1364_v23 = vpop.permute.xlu1 %1363  ;;  %1185 = vmatprep.subr.msk.bf16.mxu1 %vm1772_vm15, %v1184_v18  ;;  %v1190_v32 = vpack.c.bf16 %v674_v19, %v664_v20  ;;  %vm2106_vm14 = vnez %v2066_v26  ;;  %v1193_v2 = vpack.c.bf16 %v677_v7, %v667_v5  ;;  %v1379_v26 = vld [vmem:[#allocation2 + $0x28] sm:$0xff]  }
 0x303   : > { %v1371_v31 = vunpack.i.h.bf16 %v1369_v0  ;;  %v1370_v6 = vunpack.i.l.bf16 %v1369_v0  ;;  %v1366_v52 = vunpack.i.h.bf16 %v1364_v23  ;;  %v1365_v4 = vunpack.i.l.bf16 %v1364_v23  ;;  %vm2107_vm15 = vmpackc.low %vm1741_vm10, %vm2106_vm14 }
 0x304   : > { %vm2111_vm10 = vcmask 785408  }
 0x305   : > { %v656_v33 = vsel %vm2104_vm12, %v1370_v6, %v1371_v31  ;;  %v646_v57 = vsel %vm2105_vm5, %v1365_v4, %v1366_v52  ;;  %1188 = vmatpush1.bf16.msk.msra.mxu1 %vm1790_vm7, %v1187_v41  ;;  %v649_v34 = vsel %vm2108_vm1, 0.0, %v1365_v4  ;;  %vm2110_vm7 = vmpackc.low %vm1819_vm3, %vm1728_vm8  ;;  %vm2115_vm3 = vcmask 523264  }
 0x306   : > { %1191 = vmatprep.subr.msk.bf16.mxu1 %vm2107_vm15, %v1190_v32  ;;  %v1196_v35 = vpack.c.bf16 %v656_v33, %v646_v57  ;;  %v1200_v15 = vpack.c.bf16 %v1370_v6, %v649_v34  ;;  %vm2112_vm6 = vmmov %vm2111_vm10 }
 0x307   : > { %vm2113_vm2 = vmmov %vm2112_vm6 }
 0x308   : > { %vm2116_vm8 = vmmov %vm2115_vm3 }
 0x309   : > { %1194 = vmatpush1.bf16.msk.msra.mxu1 %vm2109_vm13, %v1193_v2 }
 0x30a   : > { %1197 = vmatprep.subr.msk.bf16.mxu1 %vm1814_vm0, %v1196_v35  ;;  %vm2114_vm0 = vmmov %vm2113_vm2 }
 0x30d   : > { %1201 = vmatpush1.bf16.msk.msra.mxu1 %vm2110_vm7, %v1200_v15 }
 0x30f   : > { %v786_v49 = vpop.permute.xlu0 %785  ;;  %v781_v46 = vpop.permute.xlu1 %780 }
 0x310   : > { %1202 = vmatmul.mubr.msk.bf16.vlgmr.msra.gmra.mxu1 %vm2111_vm10, %v1378_v38 }
 0x311   : > { %862 = vmatprep.mubr.bf16.mxu1 %v1516_v10 }
 0x313   : > { %v776_v62 = vpop.permute.xlu0 %775  ;;  %v771_v63 = vpop.permute.xlu1 %770 }
 0x317   : > { %v766_v9 = vpop.permute.xlu0 %765  ;;  %v761_v11 = vpop.permute.xlu1 %760 }
 0x318   : > { %1203 = vmatmul.mubr.msk.bf16.gmra.mxu1 %vm2112_vm6, %v1379_v26 }
 0x319   : > { %872 = vmatprep.mubr.bf16.mxu1 %v1516_v10 }
 0x31b   : > { %v756_v6 = vpop.permute.xlu0 %755  ;;  %v751_v57 = vpop.permute.xlu1 %750 }
 0x320   : > { %1204 = vmatmul.mubr.msk.bf16.gmra.mxu1 %vm2113_vm2, %v1380_v27 }
 0x321   : > { %882 = vmatprep.mubr.bf16.mxu1 %v1516_v10 }
 0x328   : > { %1205 = vmatmul.mubr.msk.bf16.gmra.mxu1 %vm2114_vm0, %v1381_v43 }
 0x3d0   : > { %v854_v37 = vpop.f32.mrf.mxu1 }
 0x3d2   : > { %v856_v25 = vpop.f32.mrf.mxu1 }
 0x3d3   : > { %v857_v35 = vadd.f32 %v856_v25, %v751_v57 }
 0x3d4   : > { %v858_v30 = vpop.f32.mrf.mxu1 }
 0x3d5   : > { %v859_v38 = vadd.f32 %v858_v30, %v756_v6 }
 0x3d6   : > { %v860_v50 = vpop.f32.mrf.mxu1 }
 0x3d7   : > { %v861_v5 = vadd.f32 %v860_v50, %v756_v6  ;;  %v894_v50 = vmax.f32 %v857_v35, 0.0 }
 0x3d8   : > { %v864_v55 = vpop.f32.mrf.mxu1 }
 0x3d9   : > { %v865_v2 = vadd.f32 %v864_v55, %v761_v11  ;;  %v896_v43 = vmax.f32 %v861_v5, 0.0 }
 0x3da   : > { %v866_v51 = vpop.f32.mrf.mxu1 }
 0x3db   : > { %v867_v0 = vadd.f32 %v866_v51, %v761_v11  ;;  %v915_v55 = vpack.c.bf16 %v896_v43, %v894_v50 }
 0x3dc   : > { %v868_v53 = vpop.f32.mrf.mxu1 }
 0x3dd   : > { %v869_v52 = vadd.f32 %v868_v53, %v766_v9  ;;  %v898_v15 = vmax.f32 %v867_v0, 0.0  ;;  %v897_v53 = vmax.f32 %v865_v2, 0.0 }
 0x3de   : > { %v870_v48 = vpop.f32.mrf.mxu1 }
 0x3df   : > { %v871_v17 = vadd.f32 %v870_v48, %v766_v9  ;;  %v899_v26 = vmax.f32 %v869_v52, 0.0  ;;  %v855_v48 = vadd.f32 %v854_v37, %v751_v57  ;;  %v1383_v37 = vld [vmem:[#allocation5 + $0x18] sm:$0xff]  }
 0x3e0   : > { %v874_v58 = vpop.f32.mrf.mxu1 }
 0x3e1   : > { %v875_v20 = vadd.f32 %v874_v58, %v771_v63  ;;  %v900_v32 = vmax.f32 %v871_v17, 0.0  ;;  %v895_v58 = vmax.f32 %v859_v38, 0.0 }
 0x3e2   : > { %v876_v59 = vpop.f32.mrf.mxu1 }
 0x3e3   : > { %v877_v42 = vadd.f32 %v876_v59, %v771_v63  ;;  %v901_v34 = vmax.f32 %v875_v20, 0.0  ;;  %v917_v51 = vpack.c.bf16 %v900_v32, %v898_v15  ;;  %v893_v59 = vmax.f32 %v855_v48, 0.0 }
 0x3e4   : > { %v878_v60 = vpop.f32.mrf.mxu1 }
 0x3e5   : > { %v879_v14 = vadd.f32 %v878_v60, %v776_v62  ;;  %v902_v23 = vmax.f32 %v877_v42, 0.0  ;;  %v914_v25 = vpack.c.bf16 %v895_v58, %v893_v59 }
 0x3e6   : > { %v880_v61 = vpop.f32.mrf.mxu1 }
 0x3e7   : > { %v881_v3 = vadd.f32 %v880_v61, %v776_v62  ;;  %v903_v4 = vmax.f32 %v879_v14, 0.0 }
 0x3e8   : > { %v884_v47 = vpop.f32.mrf.mxu1 }
 0x3e9   : > { %v885_v45 = vadd.f32 %v884_v47, %v781_v46  ;;  %v904_v36 = vmax.f32 %v881_v3, 0.0  ;;  %v918_v27 = vpack.c.bf16 %v903_v4, %v901_v34 }
 0x3ea   : > { %v886_v44 = vpop.f32.mrf.mxu1 }
 0x3eb   : > { %v887_v29 = vadd.f32 %v886_v44, %v781_v46  ;;  %v905_v41 = vmax.f32 %v885_v45, 0.0  ;;  %v919_v33 = vpack.c.bf16 %v904_v36, %v902_v23  ;;  %v1382_v46 = vld [vmem:[#allocation5 + $0x10] sm:$0xff]  }
 0x3ec   : > { %v888_v28 = vpop.f32.mrf.mxu1 }
 0x3ed   : > { %v889_v8 = vadd.f32 %v888_v28, %v786_v49  ;;  %v906_v18 = vmax.f32 %v887_v29, 0.0 }
 0x3ee   : > { %v890_v40 = vpop.f32.mrf.mxu1 }
 0x3ef   : > { %v891_v39 = vadd.f32 %v890_v40, %v786_v49  ;;  %v907_v16 = vmax.f32 %v889_v8, 0.0  ;;  %v916_v49 = vpack.c.bf16 %v899_v26, %v897_v53 }
 0x3f1   : > { %v908_v19 = vmax.f32 %v891_v39, 0.0  ;;  %v920_v7 = vpack.c.bf16 %v907_v16, %v905_v41 }
 0x3f3   : > { %v921_v31 = vpack.c.bf16 %v908_v19, %v906_v18 }
 0x3f5   : > { %946 = vmatprep.subr.bf16.mxu0 %v921_v31 }
 0x3f6   : > { %947 = vmatpush1.bf16.msra.mxu0 %v920_v7 }
 0x3f7   : > { %948 = vmatprep.subr.bf16.mxu0 %v919_v33 }
 0x3fa   : > { %949 = vmatpush1.bf16.msra.mxu0 %v918_v27 }
 0x3fb   : > { %950 = vmatprep.subr.bf16.mxu0 %v917_v51 }
 0x3fe   : > { %951 = vmatpush1.bf16.msra.mxu0 %v916_v49 }
 0x3ff   : > { %952 = vmatprep.subr.bf16.mxu0 %v915_v55 }
 0x402   : > { %953 = vmatpush1.bf16.msra.mxu0 %v914_v25 }
 0x405   : > { %1208 = vmatmul.mubr.msk.bf16.vlgmr.msra.gmra.mxu0 %vm2115_vm3, %v1382_v46 }
 0x406   : > { %980 = vmatprep.mubr.bf16.mxu0 %v1516_v10 }
 0x40d   : > { %1209 = vmatmul.mubr.msk.bf16.gmra.mxu0 %vm2116_vm8, %v1383_v37 }
 0x4c5   : > { %v972_v30 = vpop.f32.mrf.mxu0 }
 0x4c6   : > { %v991_v60 = vadd.f32 %v972_v30, %v1853_v12 }
 0x4c7   : > { %v974_v61 = vpop.f32.mrf.mxu0 }
 0x4c8   : > { %999 = vst [vmem:[%s220_s6] sm:$0xff] %v991_v60  ;;  %v992_v62 = vadd.f32 %v974_v61, %v1856_v13 }
 0x4c9   : > { %v976_v47 = vpop.f32.mrf.mxu0 }
 0x4ca   : > { %1000 = vst [vmem:[%s220_s6 + $0x8] sm:$0xff] %v992_v62  ;;  %v993_v63 = vadd.f32 %v976_v47, %v1911_v54 }
 0x4cb   : > { %v978_v10 = vpop.f32.mrf.mxu0 }
 0x4cc   : > { %1001 = vst [vmem:[%s220_s6 + $0x10] sm:$0xff] %v993_v63  ;;  %v994_v44 = vadd.f32 %v978_v10, %v1914_v56 }
 0x4cd   : > { %v982_v28 = vpop.f32.mrf.mxu0 }
 0x4ce   : > { %1002 = vst [vmem:[%s220_s6 + $0x18] sm:$0xff] %v994_v44  ;;  %v995_v3 = vadd.f32 %v982_v28, %v1867_v1 }
 0x4cf   : > { %v984_v12 = vpop.f32.mrf.mxu0 }
 0x4d0   : > { %1003 = vst [vmem:[%s220_s6 + $0x20] sm:$0xff] %v995_v3  ;;  %v996_v29 = vadd.f32 %v984_v12, %v1870_v21 }
 0x4d1   : > { %v986_v13 = vpop.f32.mrf.mxu0 }
 0x4d2   : > { %1004 = vst [vmem:[%s220_s6 + $0x28] sm:$0xff] %v996_v29  ;;  %v997_v54 = vadd.f32 %v986_v13, %v1873_v22 }
 0x4d3   : > { %v988_v56 = vpop.f32.mrf.mxu0 }
 0x4d4   : > { %1005 = vst [vmem:[%s220_s6 + $0x30] sm:$0xff] %v997_v54  ;;  %v998_v1 = vadd.f32 %v988_v56, %v1878_v24 }
 0x4d6   : > { %1006 = vst [vmem:[%s220_s6 + $0x38] sm:$0xff] %v998_v1 }
 0x4d7   : > { %1449 = shalt.err (!%p1446_p3)
}
 0x4d8   : > { %s1450_s14 = scalar_lea.hbm %s1990_s23, 1024  ;;  %s1454_s29 = scalar_lea.hbm %s2039_s4, 2048 }
 0x4d9   : > { %p1451_p2 = scmp.ne.s32.totalorder %s1990_s23, %s1450_s14  ;;  %p1455_p7 = scmp.lt.s32.totalorder %s1990_s23, %s2039_s4 }
 0x4da   : > { %p1456_p6 = scmp.lt.s32.totalorder %s1454_s29, %s1450_s14 }
 0x4db   : > { %p1452_p4 = pnand %p1451_p2, %p1585_p5 }
 0x4dc   : > { %p1457_p9 = por %p1456_p6, %p1455_p7 }
 0x4dd   : > { %p1453_p13 = pneg %p1452_p4 }
 0x4df   : > { %p1458_p10 = pnand %p1457_p9, %p1453_p13 }
 0x4e1   : > { %1461 = shalt.err (!%p1458_p10)
}
 0x4e2   : > { %s1521_s6 = smov 256  }
 0x4e3   : > { %1225 = dma.vmem_to_hbm [thread:$0]  (%p1585_p5), %s1984_s8, 1024, %s1990_s23, %s1994_s19, %s1521_s6, %s1521_s6, %s2091_s28  }
 0x4e4 PF: > { %p1242_p12 = scmp.ge.s32.totalorder %s1504_s18, 2  ;;  %s1036_s7 = sand.u32 1, %s1492_s15  }
 0x4e5   : > { %p2117_p8 = scmp.ne.s32.totalorder %s2058_s26, 0  ;;  %s1037_s9 = scalar_lea.sflag [#allocation4], %s1036_s7 }
 0x4e7   : > { %p1235_p11 = pnand %p1242_p12, %p2117_p8 }
 0x4e9   : > { %p1236_p0 = pneg %p1235_p11 }
 0x4eb   : > { %1487 = dma.done.wait (%p1236_p0), %s1037_s9, 1024  }
 0x4ec   : > { %1489 = vsyncadd (%p1236_p0), %s1037_s9, 4294966272  ;;  %p16_p1 = scmp.ge.s32.totalorder %s1572_s21, 4   ;;  %s2118_s15 = smov %s1496_s16 }
 0x4ed   : > { %s2119_s16 = smov %s1500_s17  ;;  %s2120_s17 = smov %s1583_s24 }
 0x4ee   : > { %s2121_s18 = smov %s1572_s21  ;;  %18 = sbr.rel (!%p16_p1) target bundleno = 5 (0x5), region = 83 }
 0x4f3   :  { %1042 = vsyncpa [#allocation3], 1 }
 0x4f4   :  { %1044 = vsyncpa [#allocation3 + $0x1], 1 }
 0x4f5   :  { %1045 = vsyncpa [#allocation6], 1 }
 0x4f6   :  { %1046 = vsyncpa [#allocation4], 1 }
 0x4f7   :  { %1048 = vsyncpa [#allocation4 + $0x1], 1 }

</bundles_post_ra>
